<compile_context>
chip_gen: v6e
topology: v6e:2x2x1
jax: 0.10.0
libtpu: 0.0.40
codegen_flags: <defaults>
</compile_context>

<pallas_src>
import functools

import jax
import jax.numpy as jnp
import numpy as np
from jax.experimental import pallas as pl
from jax.experimental.pallas import tpu as pltpu

_BIAS_BLOCK = 128  # lane block appended to the weight; bias lives at lane column H of that block


def _reader1_kernel(target_ref, score_ref, emb_ref, wb_ref, out_ref, *,
                    n_classes: int, loss_row: int):
    # --- load + upcast (bf16 inputs halve DMA bytes; math stays f32 for v5e) ----
    sc = score_ref[...].astype(jnp.float32)                       # (N, 1)
    emb = emb_ref[...].astype(jnp.float32)                        # (N, H)

    # --- merged = score @ sents_emb as a VPU weighted sum + sublane reduction ---
    merged = jnp.sum(sc * emb, axis=0, keepdims=True)             # (1, H)

    # --- L2 normalize (torch.nn.functional.normalize, eps = 1e-12) --------------
    sq_norm = jnp.sum(merged * merged, axis=1, keepdims=True)     # (1, 1)
    eps = jnp.float32(1e-12)
    merged = merged * jax.lax.rsqrt(jnp.maximum(sq_norm, eps * eps))   # EUP rsqrt

    # --- classifier: append a constant 1.0 feature at lane column H so ONE ------
    #     multiply + lane reduction over (H + 128) yields w.x + b directly
    #     (bias is stored at wb[:, H]); no 1-lane slice, no separate add.
    ones_col = (jax.lax.broadcasted_iota(jnp.int32, (1, _BIAS_BLOCK), 1) == 0
                ).astype(jnp.float32)                             # (1, 128): 1.0 at lane 0
    merged_ext = jnp.concatenate([merged, ones_col], axis=1)      # (1, H + 128)
    logits_col = jnp.sum(merged_ext * wb_ref[...], axis=1, keepdims=True)   # (R, 1)

    # --- CrossEntropyLoss (single target id, B == 1) -----------------------------
    row_ids = jax.lax.broadcasted_iota(jnp.int32, logits_col.shape, 0)      # (R, 1)
    valid = row_ids < n_classes
    masked = jnp.where(valid, logits_col, jnp.float32(-1e30))
    m = jnp.max(masked, axis=0, keepdims=True)                              # (1, 1)
    sum_exp = jnp.sum(jnp.where(valid, jnp.exp(masked - m), 0.0),
                      axis=0, keepdims=True)                                # (1, 1)
    lse = jnp.log(sum_exp) + m
    tgt = target_ref[0]
    # picked masked with `valid` so it never depends on padded wb rows being zero
    onehot = jnp.where((row_ids == tgt) & valid, jnp.float32(1.0), jnp.float32(0.0))
    picked = jnp.sum(logits_col * onehot, axis=0, keepdims=True)            # (1, 1)
    loss = lse - picked                                                     # mean over B == 1

    # --- compose loss into row `loss_row` of the (R, 1) column, then a single ----
    #     dense unmasked (R, 128) store (no full-tile iota/compare/select).
    out_col = jnp.where(row_ids == loss_row, loss, logits_col)              # (R, 1)
    out_ref[...] = jnp.broadcast_to(out_col, out_ref.shape)


def make_reader1_head(weight, bias):
    """Build the fused classifier weight+bias constant ONCE (model init time).

    weight: (C, H) in torch nn.Linear layout (out_features x in_features)
    bias:   (C,)
    Returns (wb, n_classes): wb is (R, H + 128) with the lane-dense weight in
    [:, :H], the bias at lane column H, and zeros elsewhere (padded rows zero).
    """
    weight = np.asarray(weight, np.float32)
    bias = np.asarray(bias, np.float32)
    C, H = weight.shape
    assert H % 128 == 0, "hidden size must be lane aligned (768 for BERT)"
    R = ((C + 1 + 7) // 8) * 8          # logits rows 0..C-1 plus loss row C, sublane padded
    wb = np.zeros((R, H + _BIAS_BLOCK), np.float32)
    wb[:C, :H] = weight
    wb[:C, H] = bias
    return jnp.asarray(wb), C


@functools.partial(jax.jit, static_argnames=("n_classes",))
def reader1_forward(score, sents_emb, wb, target, *, n_classes):
    """Reader1 head.

    score:     (N,) selection scores over the N candidate sentences (any float dtype)
    sents_emb: (N, H) CLS embeddings from the encoder (bf16 or f32)
    wb:        (R, H+128) fused classifier weight+bias from make_reader1_head
    target:    (1,) int32 gold class id
    Returns (logits (1, C) f32, loss scalar f32).
    """
    N, H = sents_emb.shape
    R = wb.shape[0]
    C = n_classes
    score_col = score.reshape(N, 1)

    cost = pl.CostEstimate(
        flops=2 * N * H + 2 * R * (H + _BIAS_BLOCK) + 8 * R,
        transcendentals=R + 2,
        bytes_accessed=(score_col.size * score_col.dtype.itemsize
                        + sents_emb.size * sents_emb.dtype.itemsize
                        + wb.size * wb.dtype.itemsize
                        + R * 128 * 4))

    out = pl.pallas_call(
        functools.partial(_reader1_kernel, n_classes=C, loss_row=C),
        out_shape=jax.ShapeDtypeStruct((R, 128), jnp.float32),
        in_specs=[
            pl.BlockSpec(memory_space=pltpu.SMEM),   # target class id (scalar)
            pl.BlockSpec(memory_space=pltpu.VMEM),   # score column (N, 1)
            pl.BlockSpec(memory_space=pltpu.VMEM),   # CLS embeddings (N, H), bf16 ok
            pl.BlockSpec(memory_space=pltpu.VMEM),   # fused classifier weight+bias (R, H+128)
        ],
        out_specs=pl.BlockSpec(memory_space=pltpu.VMEM),
        cost_estimate=cost,
    )(target, score_col, sents_emb, wb)

    logits = out[:C, 0].reshape(1, C)
    loss = out[C, 0]
    return logits, loss


def _reference(score, sents_emb_f32, weight, bias, target_cls):
    merged = jnp.asarray(score, jnp.float32).reshape(1, -1) @ sents_emb_f32
    merged = merged / jnp.maximum(
        jnp.linalg.norm(merged, axis=1, keepdims=True), 1e-12)
    logits = merged @ weight.T + bias.reshape(1, -1)
    logp = jax.nn.log_softmax(logits, axis=1)
    loss = -jnp.mean(logp[:, target_cls])
    return logits, loss


if __name__ == "__main__":
    # N = 8 candidate sentences, H = 768 (BERT hidden), C = 4 relation classes, B = 1 query.
    rels = ["rel_a", "rel_b", "rel_c", "rel_d"]
    N, H = 8, 768
    C = len(rels)

    key = jax.random.PRNGKey(0)
    k_score, k_emb, k_w, k_b = jax.random.split(key, 4)

    score = jax.random.uniform(k_score, (N,), dtype=jnp.float32)
    # Encoder CLS embeddings consumed in the encoder's native bf16 (halves the dominant DMA).
    sents_emb = jax.random.normal(k_emb, (N, H), dtype=jnp.float32).astype(jnp.bfloat16)
    weight = jax.random.normal(k_w, (C, H), dtype=jnp.float32) * 0.02    # nn.Linear(768, C).weight
    bias = jax.random.normal(k_b, (C,), dtype=jnp.float32) * 0.02        # nn.Linear(768, C).bias
    target_cls = 2                                                       # rel = "rel_c"

    # ---- init-time (one-off): build the fused classifier constant ----------------
    wb, n_classes = make_reader1_head(weight, bias)

    # Host-side bounds check (PyTorch CrossEntropyLoss would raise on an OOB target).
    assert 0 <= target_cls < n_classes, "target class out of range"
    target = jnp.asarray([target_cls], dtype=jnp.int32)

    logits, loss = reader1_forward(score, sents_emb, wb, target, n_classes=n_classes)
    logits, loss = jax.block_until_ready((logits, loss))

    # rels[argmax(softmax(logits), dim=1)] — softmax kept for parity with the module.
    pred_rel = rels[int(jnp.argmax(jax.nn.softmax(logits, axis=1), axis=1)[0])]

    ref_logits, ref_loss = _reference(score, sents_emb.astype(jnp.float32),
                                      weight, bias, target_cls)
    assert np.allclose(np.asarray(logits), np.asarray(ref_logits), atol=1e-3), "logits mismatch"
    assert np.allclose(float(loss), float(ref_loss), atol=1e-3), "loss mismatch"
    assert pred_rel == rels[int(jnp.argmax(ref_logits, axis=1)[0])], "pred mismatch"

    print("KERNEL_OK")
</pallas_src>

<mosaic_0001>
module attributes {stable_mosaic.version = 11 : i64} {
  func.func @_reader1_kernel(%arg0: memref<1xi32, #tpu.memory_space<smem>>, %arg1: memref<8x1xf32, #tpu.memory_space<vmem>>, %arg2: memref<8x768xbf16, #tpu.memory_space<vmem>>, %arg3: memref<8x896xf32, #tpu.memory_space<vmem>>, %arg4: memref<8x128xf32, #tpu.memory_space<vmem>>) attributes {dimension_semantics = [], scalar_prefetch = 0 : i64, scratch_operands = 0 : i64, tpu.core_type = #tpu.core_type<tc>} {
    %c0 = arith.constant 0 : index
    %c0_0 = arith.constant 0 : index
    %0 = vector.load %arg1[%c0, %c0_0] : memref<8x1xf32, #tpu.memory_space<vmem>>, vector<8x1xf32>
    %c0_1 = arith.constant 0 : index
    %c0_2 = arith.constant 0 : index
    %1 = vector.load %arg2[%c0_1, %c0_2] : memref<8x768xbf16, #tpu.memory_space<vmem>>, vector<8x768xbf16>
    %2 = arith.extf %1 : vector<8x768xbf16> to vector<8x768xf32>
    %3 = vector.broadcast %0 : vector<8x1xf32> to vector<8x768xf32>
    %4 = arith.mulf %3, %2 : vector<8x768xf32>
    %cst = arith.constant dense<0.000000e+00> : vector<768xf32>
    %5 = vector.multi_reduction <add>, %4, %cst [0] : vector<8x768xf32> to vector<768xf32>
    %6 = vector.shape_cast %5 : vector<768xf32> to vector<1x768xf32>
    %7 = arith.mulf %6, %6 : vector<1x768xf32>
    %cst_3 = arith.constant dense<0.000000e+00> : vector<1xf32>
    %8 = vector.multi_reduction <add>, %7, %cst_3 [1] : vector<1x768xf32> to vector<1xf32>
    %9 = vector.shape_cast %8 : vector<1xf32> to vector<1x1xf32>
    %cst_4 = arith.constant 9.99999996E-13 : f32
    %cst_5 = arith.constant 9.99999996E-13 : f32
    %10 = arith.mulf %cst_4, %cst_5 : f32
    %11 = vector.broadcast %10 : f32 to vector<1x1xf32>
    %12 = arith.maximumf %9, %11 : vector<1x1xf32>
    %13 = math.rsqrt %12 : vector<1x1xf32>
    %14 = vector.broadcast %13 : vector<1x1xf32> to vector<1x768xf32>
    %15 = arith.mulf %6, %14 : vector<1x768xf32>
    %16 = tpu.iota {dimensions = array<i32: 1>} : vector<1x128xi32>
    %c0_i32 = arith.constant 0 : i32
    %17 = vector.broadcast %c0_i32 : i32 to vector<1x128xi32>
    %18 = arith.cmpi eq, %16, %17 : vector<1x128xi32>
    %19 = arith.extui %18 : vector<1x128xi1> to vector<1x128xi32>
    %20 = arith.sitofp %19 : vector<1x128xi32> to vector<1x128xf32>
    %21 = tpu.concatenate %15, %20 in 1 : vector<1x768xf32>, vector<1x128xf32> -> vector<1x896xf32>
    %c0_6 = arith.constant 0 : index
    %c0_7 = arith.constant 0 : index
    %22 = vector.load %arg3[%c0_6, %c0_7] : memref<8x896xf32, #tpu.memory_space<vmem>>, vector<8x896xf32>
    %23 = vector.broadcast %21 : vector<1x896xf32> to vector<8x896xf32>
    %24 = arith.mulf %23, %22 : vector<8x896xf32>
    %cst_8 = arith.constant dense<0.000000e+00> : vector<8xf32>
    %25 = vector.multi_reduction <add>, %24, %cst_8 [1] : vector<8x896xf32> to vector<8xf32>
    %26 = vector.shape_cast %25 : vector<8xf32> to vector<8x1xf32>
    %27 = tpu.iota {dimensions = array<i32: 0>} : vector<8x1xi32>
    %c4_i32 = arith.constant 4 : i32
    %28 = vector.broadcast %c4_i32 : i32 to vector<8x1xi32>
    %29 = arith.cmpi slt, %27, %28 : vector<8x1xi32>
    %cst_9 = arith.constant -1.000000e+30 : f32
    %30 = vector.broadcast %cst_9 : f32 to vector<8x1xf32>
    %31 = arith.select %29, %26, %30 : vector<8x1xi1>, vector<8x1xf32>
    %cst_10 = arith.constant dense<0xFF800000> : vector<1xf32>
    %32 = vector.multi_reduction <maximumf>, %31, %cst_10 [0] : vector<8x1xf32> to vector<1xf32>
    %33 = vector.shape_cast %32 : vector<1xf32> to vector<1x1xf32>
    %34 = vector.broadcast %33 : vector<1x1xf32> to vector<8x1xf32>
    %35 = arith.subf %31, %34 : vector<8x1xf32>
    %36 = math.exp %35 : vector<8x1xf32>
    %cst_11 = arith.constant 0.000000e+00 : f32
    %37 = vector.broadcast %cst_11 : f32 to vector<8x1xf32>
    %38 = arith.select %29, %36, %37 : vector<8x1xi1>, vector<8x1xf32>
    %cst_12 = arith.constant dense<0.000000e+00> : vector<1xf32>
    %39 = vector.multi_reduction <add>, %38, %cst_12 [0] : vector<8x1xf32> to vector<1xf32>
    %40 = vector.shape_cast %39 : vector<1xf32> to vector<1x1xf32>
    %41 = math.log %40 : vector<1x1xf32>
    %42 = arith.addf %41, %33 : vector<1x1xf32>
    %c0_13 = arith.constant 0 : index
    %43 = memref.load %arg0[%c0_13] : memref<1xi32, #tpu.memory_space<smem>>
    %44 = vector.broadcast %43 : i32 to vector<8x1xi32>
    %45 = arith.cmpi eq, %27, %44 : vector<8x1xi32>
    %46 = arith.andi %45, %29 : vector<8x1xi1>
    %cst_14 = arith.constant 1.000000e+00 : f32
    %cst_15 = arith.constant 0.000000e+00 : f32
    %47 = vector.broadcast %cst_14 : f32 to vector<8x1xf32>
    %48 = vector.broadcast %cst_15 : f32 to vector<8x1xf32>
    %49 = arith.select %46, %47, %48 : vector<8x1xi1>, vector<8x1xf32>
    %50 = arith.mulf %26, %49 : vector<8x1xf32>
    %cst_16 = arith.constant dense<0.000000e+00> : vector<1xf32>
    %51 = vector.multi_reduction <add>, %50, %cst_16 [0] : vector<8x1xf32> to vector<1xf32>
    %52 = vector.shape_cast %51 : vector<1xf32> to vector<1x1xf32>
    %53 = arith.subf %42, %52 : vector<1x1xf32>
    %c4_i32_17 = arith.constant 4 : i32
    %54 = vector.broadcast %c4_i32_17 : i32 to vector<8x1xi32>
    %55 = arith.cmpi eq, %27, %54 : vector<8x1xi32>
    %56 = vector.shape_cast %53 : vector<1x1xf32> to vector<1x1xf32>
    %57 = vector.broadcast %56 : vector<1x1xf32> to vector<8x1xf32>
    %58 = arith.select %55, %57, %26 : vector<8x1xi1>, vector<8x1xf32>
    %59 = vector.shape_cast %58 : vector<8x1xf32> to vector<8x1xf32>
    %60 = vector.broadcast %59 : vector<8x1xf32> to vector<8x128xf32>
    %c0_18 = arith.constant 0 : index
    %c0_19 = arith.constant 0 : index
    %61 = vector.load %arg4[%c0_18, %c0_19] : memref<8x128xf32, #tpu.memory_space<vmem>>, vector<8x128xf32>
    tpu.vector_store %arg4[%c0_18, %c0_19], %60 {strides = array<i32>} : memref<8x128xf32, #tpu.memory_space<vmem>>, vector<8x128xf32>,
    return
  }
}

</mosaic_0001>

<bundles_post_ra>
// kernel: reader1_forward.1
= control target key start
LH: loop header
LB: loop body
LE: loop exit
PB: predicated region body
PF: predicated region fallthrough
CT: control target
= control target key end

     0   :  { %10 = vsyncpa [#allocation4], 0  ;;  %s332_s0 = inlined_call_operand.<no memory space> [shape: s32[1], index: 0, kind: input, shape index: {}]   ;;  %s333_s1 = inlined_call_operand.vmem [shape: f32[8,1], index: 1, kind: input, shape index: {}]   ;;  %s334_s2 = inlined_call_operand.hbm [shape: bf16[8,768], index: 2, kind: input, shape index: {}]   ;;  %s335_s3 = inlined_call_operand.hbm [shape: f32[8,896], index: 3, kind: input, shape index: {}]   ;;  %s336_s4 = inlined_call_operand.vmem [shape: f32[8,128], index: 4, kind: output, shape index: {}]  }
   0x1   :  { %11 = vsyncpa [#allocation6], 0  ;;  %s276_s15 = smov [#allocation3]   ;;  %s277_s17 = smov [#allocation5]  }
   0x2   :  { %s22_s16 = sshll.u32 %s276_s15, 4  ;;  %s32_s18 = sshll.u32 %s277_s17, 4  ;;  %s23_s16 = int_to_ptr.vmem [resolvable:$true] %s22_s16  ;;  %s33_s18 = int_to_ptr.vmem [resolvable:$true] %s32_s18 }
   0x3   :  { %s240_s19 = scalar_lea.vmem %s23_s16, 384  ;;  %p245_p1 = scmp.lt.s32.totalorder %s23_s16, %s23_s16 }
   0x4   :  { %p241_p0 = scmp.ne.s32.totalorder %s23_s16, %s240_s19  ;;  %p246_p2 = scmp.lt.s32.totalorder %s240_s19, %s240_s19 }
   0x6   :  { %p247_p3 = por %p246_p2, %p245_p1 }
   0x8   :  { %p248_p4 = pnand %p247_p3, %p241_p0 }
   0xa   :  { %251 = shalt.err (!%p248_p4)
}
   0xb   :  { %25 = dma.hbm_to_vmem [thread:$0]  %s334_s2, 384, %s23_s16, [#allocation4]  }
   0xc   :  { %s260_s22 = scalar_lea.vmem %s33_s18, 896  ;;  %p265_p6 = scmp.lt.s32.totalorder %s33_s18, %s33_s18 }
   0xd   :  { %p261_p5 = scmp.ne.s32.totalorder %s33_s18, %s260_s22  ;;  %p266_p7 = scmp.lt.s32.totalorder %s260_s22, %s260_s22 }
   0xf   :  { %p267_p8 = por %p266_p7, %p265_p6 }
  0x11   :  { %p268_p9 = pnand %p267_p8, %p261_p5 }
  0x13   :  { %271 = shalt.err (!%p268_p9)
}
  0x14   :  { %35 = dma.hbm_to_vmem [thread:$0]  %s335_s3, 896, %s33_s18, [#allocation6]  }
  0x15   :  { %272 = dma.done.wait [#allocation4], 384  }
  0x16   :  { %273 = vsyncadd [#allocation4], 4294966912 }
  0x17   :  { %274 = dma.done.wait [#allocation6], 896  }
  0x18   :  { %275 = vsyncadd [#allocation6], 4294966400  ;;  %v278_v0 = vmov 0   ;;  %v42_v1 = vld [vmem:[%s333_s1] sm:$0xff]  ;;  %v44_v3 = vld [vmem:[#allocation3 + $0x8] sm:$0xff] }
  0x19   :  { %225 = vset.pattern.permute.xlu0 %v278_v0  ;;  %v43_v2 = vld [vmem:[#allocation3] sm:$0xff]  ;;  %v45_v4 = vld [vmem:[#allocation3 + $0x10] sm:$0xff]  ;;  %v48_v7 = vunpack.c.l.bf16 %v44_v3  ;;  %v49_v8 = vunpack.c.h.bf16 %v44_v3  ;;  %v199_v3 = vstv %s332_s0 }
  0x1a   :  { %54 = vperm.xlu0 %225, %v42_v1   ;;  %v46_v5 = vunpack.c.l.bf16 %v43_v2  ;;  %v47_v6 = vunpack.c.h.bf16 %v43_v2  ;;  %v50_v9 = vunpack.c.l.bf16 %v45_v4  ;;  %v51_v10 = vunpack.c.h.bf16 %v45_v4 }
  0x1b   :  { %v120_v1 = vlaneseq  ;;  %v279_v4 = vmov 0.0  }
  0x1d   :  { %v314_v2 = vshrl.u32 %v120_v1, 7 }
  0x1f   :  { %vm177_vm0 = vcmp.lt.s32.totalorder %v314_v2, 4  ;;  %vm200_vm1 = vcmp.eq.s32.totalorder %v314_v2, %v199_v3  ;;  %vm211_vm4 = vcmp.eq.s32.totalorder %v314_v2, 4 }
  0x20   :  { %vm201_vm2 = vmand %vm200_vm1, %vm177_vm0 }
  0x95   :  { %v55_v11 = vpop.permute.xlu0 %54 }
  0x96   :  { %v57_v12 = vmul.f32 %v55_v11, %v46_v5  ;;  %v58_v13 = vmul.f32 %v55_v11, %v47_v6  ;;  %v59_v14 = vmul.f32 %v55_v11, %v48_v7  ;;  %v60_v15 = vmul.f32 %v55_v11, %v49_v8 }
  0x97   :  { %v61_v16 = vmul.f32 %v55_v11, %v50_v9  ;;  %v62_v17 = vmul.f32 %v55_v11, %v51_v10  ;;  %v202_v5 = vsel %vm201_vm2, 1.0, %v279_v4  ;;  %v121_v8 = vand.u32 127, %v120_v1 }
  0x98   :  { %v63_v18 = vrot.slane %v57_v12, 4  ;;  %v69_v19 = vrot.slane %v58_v13, 4  ;;  %v75_v20 = vrot.slane %v59_v14, 4  ;;  %v81_v21 = vrot.slane %v60_v15, 4 }
  0x99   :  { %v87_v22 = vrot.slane %v61_v16, 4  ;;  %v93_v23 = vrot.slane %v62_v17, 4  ;;  %v134_v9 = vsub.s32 0, %v314_v2  ;;  %vm122_vm3 = vcmp.eq.s32.totalorder %v121_v8, 0 }
  0x9a   :  { %v64_v24 = vadd.f32 %v63_v18, %v57_v12  ;;  %v70_v25 = vadd.f32 %v69_v19, %v58_v13  ;;  %v76_v26 = vadd.f32 %v75_v20, %v59_v14  ;;  %v82_v27 = vadd.f32 %v81_v21, %v60_v15  ;;  %v125_v15 = vld [vmem:[#allocation5] sm:$0xff]  ;;  %v127_v21 = vld [vmem:[#allocation5 + $0x10] sm:$0xff] }
  0x9b   :  { %v88_v28 = vadd.f32 %v87_v22, %v61_v16  ;;  %v94_v29 = vadd.f32 %v93_v23, %v62_v17  ;;  %v126_v16 = vld [vmem:[#allocation5 + $0x8] sm:$0xff] }
  0x9c   :  { %v65_v30 = vrot.slane %v64_v24, 2  ;;  %v71_v31 = vrot.slane %v70_v25, 2  ;;  %v77_v32 = vrot.slane %v76_v26, 2  ;;  %v83_v33 = vrot.slane %v82_v27, 2 }
  0x9d   :  { %v89_v34 = vrot.slane %v88_v28, 2  ;;  %v95_v35 = vrot.slane %v94_v29, 2 }
  0x9e   :  { %v66_v36 = vadd.f32 %v65_v30, %v64_v24  ;;  %v72_v37 = vadd.f32 %v71_v31, %v70_v25  ;;  %v78_v38 = vadd.f32 %v77_v32, %v76_v26  ;;  %v84_v39 = vadd.f32 %v83_v33, %v82_v27  ;;  %v128_v27 = vld [vmem:[#allocation5 + $0x18] sm:$0xff]  ;;  %v129_v31 = vld [vmem:[#allocation5 + $0x20] sm:$0xff] }
  0x9f   :  { %v90_v40 = vadd.f32 %v89_v34, %v88_v28  ;;  %v96_v41 = vadd.f32 %v95_v35, %v94_v29  ;;  %v220_v26 = vsel %vm122_vm3, 1.0, %v279_v4 }
  0xa0   :  { %v67_v42 = vrot.slane %v66_v36, 1  ;;  %v73_v43 = vrot.slane %v72_v37, 1  ;;  %v79_v44 = vrot.slane %v78_v38, 1  ;;  %v85_v45 = vrot.slane %v84_v39, 1 }
  0xa1   :  { %v91_v49 = vrot.slane %v90_v40, 1  ;;  %v97_v51 = vrot.slane %v96_v41, 1  ;;  %v159_v33 = vrot.slane %v220_v26, %v134_v9 }
  0xa2   :  { %v68_v46 = vadd.f32 %v67_v42, %v66_v36  ;;  %v74_v47 = vadd.f32 %v73_v43, %v72_v37  ;;  %v80_v48 = vadd.f32 %v79_v44, %v78_v38  ;;  %v86_v50 = vadd.f32 %v85_v45, %v84_v39  ;;  %v130_v36 = vld [vmem:[#allocation5 + $0x28] sm:$0xff]  ;;  %v131_v37 = vld [vmem:[#allocation5 + $0x30] sm:$0xff] }
  0xa3   :  { %v92_v54 = vadd.f32 %v91_v49, %v90_v40  ;;  %v98_v57 = vadd.f32 %v97_v51, %v96_v41  ;;  %v166_v41 = vmul.f32 %v159_v33, %v131_v37 }
  0xa4   :  { %v99_v52 = vmul.f32 %v68_v46, %v68_v46  ;;  %v100_v53 = vmul.f32 %v74_v47, %v74_v47  ;;  %v101_v55 = vmul.f32 %v80_v48, %v80_v48  ;;  %v102_v58 = vmul.f32 %v86_v50, %v86_v50 }
  0xa5   :  { %v103_v60 = vmul.f32 %v92_v54, %v92_v54  ;;  %v104_v62 = vmul.f32 %v98_v57, %v98_v57 }
  0xa6   :  { %v105_v56 = vadd.f32 %v100_v53, %v99_v52 }
  0xa8   :  { %v106_v59 = vadd.f32 %v105_v56, %v101_v55 }
  0xaa   :  { %v107_v61 = vadd.f32 %v106_v59, %v102_v58 }
  0xac   :  { %v108_v63 = vadd.f32 %v107_v61, %v103_v60 }
  0xae   :  { %v109_v0 = vadd.f32 %v108_v63, %v104_v62 }
  0xb0   :  { %110 = vadd.xlane.f32.xlu0 %v109_v0 }
 0x139   :  { %v111_v6 = vpop.xlane.xlu0 %110 }
 0x13a   :  { %v112_v7 = vmax.f32 %v111_v6, 1e-24 }
 0x13c   :  { %226 = vrsqrt.f32 %v112_v7 }
 0x149   :  { %v227_v10 = vpop.eup %226 }
 0x14a   :  { %v114_v11 = vmul.f32 %v227_v10, %v68_v46  ;;  %v115_v12 = vmul.f32 %v227_v10, %v74_v47  ;;  %v116_v13 = vmul.f32 %v227_v10, %v80_v48  ;;  %v117_v14 = vmul.f32 %v227_v10, %v86_v50 }
 0x14b   :  { %v118_v17 = vmul.f32 %v227_v10, %v92_v54  ;;  %v119_v22 = vmul.f32 %v227_v10, %v98_v57 }
 0x14c   :  { %v135_v18 = vrot.slane %v114_v11, %v134_v9  ;;  %v139_v19 = vrot.slane %v115_v12, %v134_v9  ;;  %v143_v20 = vrot.slane %v116_v13, %v134_v9  ;;  %v147_v23 = vrot.slane %v117_v14, %v134_v9 }
 0x14d   :  { %v151_v28 = vrot.slane %v118_v17, %v134_v9  ;;  %v155_v32 = vrot.slane %v119_v22, %v134_v9 }
 0x14e   :  { %v160_v24 = vmul.f32 %v135_v18, %v125_v15  ;;  %v161_v25 = vmul.f32 %v139_v19, %v126_v16  ;;  %v162_v29 = vmul.f32 %v143_v20, %v127_v21  ;;  %v163_v34 = vmul.f32 %v147_v23, %v128_v27 }
 0x14f   :  { %v164_v38 = vmul.f32 %v151_v28, %v129_v31  ;;  %v165_v40 = vmul.f32 %v155_v32, %v130_v36 }
 0x150   :  { %v167_v30 = vadd.f32 %v161_v25, %v160_v24 }
 0x152   :  { %v168_v35 = vadd.f32 %v167_v30, %v162_v29 }
 0x154   :  { %v169_v39 = vadd.f32 %v168_v35, %v163_v34 }
 0x156   :  { %v170_v42 = vadd.f32 %v169_v39, %v164_v38 }
 0x158   :  { %v171_v43 = vadd.f32 %v170_v42, %v165_v40 }
 0x15a   :  { %v172_v44 = vadd.f32 %v171_v43, %v166_v41 }
 0x15c   :  { %173 = vadd.xlane.f32.xlu1 %v172_v44 }
 0x1e5   :  { %v174_v45 = vpop.xlane.xlu1 %173 }
 0x1e6   :  { %v178_v46 = vsel %vm177_vm0, %v174_v45, -1e+30  ;;  %v203_v60 = vmul.f32 %v202_v5, %v174_v45 }
 0x1e7   :  { %v179_v47 = vrot.slane %v178_v46, 4 }
 0x1e8   :  { %v204_v63 = vrot.slane %v203_v60, 4 }
 0x1e9   :  { %v180_v48 = vmax.f32 %v178_v46, %v179_v47 }
 0x1ea   :  { %v205_v1 = vadd.f32 %v204_v63, %v203_v60 }
 0x1eb   :  { %v181_v49 = vrot.slane %v180_v48, 2 }
 0x1ec   :  { %v206_v3 = vrot.slane %v205_v1, 2 }
 0x1ed   :  { %v182_v50 = vmax.f32 %v180_v48, %v181_v49 }
 0x1ee   :  { %v207_v4 = vadd.f32 %v206_v3, %v205_v1 }
 0x1ef   :  { %v183_v51 = vrot.slane %v182_v50, 1 }
 0x1f0   :  { %v208_v6 = vrot.slane %v207_v4, 1 }
 0x1f1   :  { %v184_v52 = vmax.f32 %v182_v50, %v183_v51 }
 0x1f2   :  { %v209_v10 = vadd.f32 %v208_v6, %v207_v4 }
 0x1f3   :  { %v185_v53 = vsub.f32 %v178_v46, %v184_v52 }
 0x1f5   :  { %v186_v54 = vmul.f32 1.442695, %v185_v53 }
 0x1f7   :  { %228 = vpow2.f32 %v186_v54 }
 0x204   :  { %v229_v55 = vpop.eup %228 }
 0x205   :  { %v188_v56 = vsel %vm177_vm0, %v229_v55, 0.0 }
 0x206   :  { %v189_v57 = vrot.slane %v188_v56, 4 }
 0x208   :  { %v190_v58 = vadd.f32 %v189_v57, %v188_v56 }
 0x20a   :  { %v191_v59 = vrot.slane %v190_v58, 2 }
 0x20c   :  { %v192_v61 = vadd.f32 %v191_v59, %v190_v58 }
 0x20e   :  { %v193_v62 = vrot.slane %v192_v61, 1 }
 0x210   :  { %v194_v0 = vadd.f32 %v193_v62, %v192_v61 }
 0x212   :  { %230 = vlog2.f32 %v194_v0 }
 0x21f   :  { %v231_v7 = vpop.eup %230 }
 0x220   :  { %v196_v8 = vmul.f32 0.6931472, %v231_v7 }
 0x222   :  { %v197_v9 = vadd.f32 %v196_v8, %v184_v52 }
 0x224   :  { %v210_v11 = vsub.f32 %v197_v9, %v209_v10 }
 0x226   :  { %v212_v12 = vsel %vm211_vm4, %v210_v11, %v174_v45 }
 0x227   :  { %213 = vst [vmem:[%s336_s4] sm:$0xff] %v212_v12 }
 0x228   :  { %218 = vsyncpa [#allocation4], 1 }
 0x229   :  { %219 = vsyncpa [#allocation6], 1 }

</bundles_post_ra>
